<compile_context>
chip_gen: v5e
topology: v5e:2x2
jax: 0.10.0
libtpu: 0.0.40
codegen_flags: <defaults>
</compile_context>

<pallas_src>
import functools

import jax
import jax.numpy as jnp
from jax.experimental import pallas as pl
from jax.experimental.pallas import tpu as pltpu

EPS = 1e-5


def _celu(x):
    # CELU(alpha=1) = max(0, x) + min(0, exp(x) - 1); clamp the exp arg for safety.
    return jnp.where(x > 0.0, x, jnp.exp(jnp.minimum(x, 0.0)) - 1.0)


def _batchnorm(a, gamma, beta, inv_m):
    # a: (F, M) f32; per-channel (row) training-mode stats over the lane axis.
    # One-pass sum / sum-of-squares, biased variance, clamped at 0.
    s = jnp.sum(a, axis=1, keepdims=True)
    ss = jnp.sum(a * a, axis=1, keepdims=True)
    mean = s * inv_m
    var = jnp.maximum(ss * inv_m - mean * mean, 0.0)
    return (a - mean) * (jax.lax.rsqrt(var + EPS) * gamma) + beta


def _resblock_kernel(shifts,
                     p1_ref, d_ref, msk_ref, w1_ref, w2_ref,
                     g1_ref, b1_ref, g2_ref, b2_ref,
                     out_ref):
    # p1_ref : (K1p, M)   bf16  conv1 im2col columns (K zero-padded, M on lane axis)
    # d_ref  : (F, M)     f32   shortcut, zero-padded to all F channels
    # msk_ref: (9, M)     bf16  per-tap conv2 zero-padding masks
    # w1_ref : (F, K1p)   bf16  conv1 weights (K zero-padded)
    # w2_ref : (9, F, F)  bf16  conv2 weights, one (F, F) block per 3x3 tap
    # g*/b*  : (F, 1)     f32   BatchNorm gamma / beta
    # out_ref: (F, M)     f32   lane-dense output
    F, M = out_ref.shape
    inv_m = 1.0 / float(M)

    # ---- conv1: one deep-K MXU matmul ----
    a1 = jnp.dot(w1_ref[...], p1_ref[...], preferred_element_type=jnp.float32)

    # ---- bn1 (one-pass batch stats) + CELU, f32 ----
    h1 = _celu(_batchnorm(a1, g1_ref[...], b1_ref[...], inv_m))          # (F, M)

    # ---- conv2: 9 per-tap MXU matmuls accumulated in f32 (no column scratch) ----
    # Each tap = XLU lane rotation of h1 * boundary mask, cast to bf16.
    masks = msk_ref[...].astype(jnp.float32)                             # (9, M)
    acc = jnp.zeros((F, M), jnp.float32)
    for t in range(9):
        r = shifts[t]
        blk = h1 if r == 0 else pltpu.roll(h1, r, axis=1)
        col = (blk * masks[t:t + 1, :]).astype(jnp.bfloat16)             # (F, M) bf16
        acc = acc + jnp.dot(w2_ref[t], col, preferred_element_type=jnp.float32)

    # ---- bn2 ----
    h2 = _batchnorm(acc, g2_ref[...], b2_ref[...], inv_m)

    # ---- shortcut (already zero-padded to F channels) + CELU: one dense store ----
    out_ref[...] = _celu(h2 + d_ref[...])


def resblock_forward(x_nchw, params, *, roll_sign=-1):
    """x_nchw: (N, F//2, H, W) f32 NCHW (like the PyTorch module).
    Returns (N, F, H//2, W//2) f32 NCHW.

    roll_sign: static sign applied to the conv2 tap offsets before pltpu.roll.
    -1 matches the documented jnp.roll convention (element i moves to i+shift)."""
    w1, w2, g1, b1, g2, b2 = params          # w1: (F, Cin, 3, 3), w2: (F, F, 3, 3) OIHW
    N, Cin, H, W = x_nchw.shape
    F = w1.shape[0]
    assert H % 2 == 0 and W % 2 == 0, "even spatial dims expected for the stride-2 block"
    Ho, Wo = H // 2, W // 2
    M = N * Ho * Wo

    x = x_nchw.astype(jnp.float32)

    # ---- layout glue (plain JAX): im2col / space-to-depth for the stride-2 conv1 ----
    xp = jnp.pad(x, ((0, 0), (0, 0), (1, 1), (1, 1)))
    taps = [xp[:, :, kh:kh + 2 * Ho:2, kw:kw + 2 * Wo:2]        # (N, Cin, Ho, Wo) each
            for kh in range(3) for kw in range(3)]
    p1 = jnp.stack(taps, axis=0)                                 # (9, N, Cin, Ho, Wo)
    p1 = jnp.transpose(p1, (0, 2, 1, 3, 4)).reshape(9 * Cin, M)  # (9*Cin, M)

    # zero-pad the conv1 K dim to a clean sublane multiple (does not change the matmul)
    K1 = 9 * Cin
    K1p = ((K1 + 7) // 8) * 8
    p1 = jnp.pad(p1, ((0, K1p - K1), (0, 0)))
    w1f = jnp.transpose(w1, (0, 2, 3, 1)).reshape(F, K1)         # (F, 9*Cin)
    w1f = jnp.pad(w1f, ((0, 0), (0, K1p - K1)))                  # (F, K1p)

    # conv2 weights per tap: w2_taps[kh*3+kw] = w2[:, :, kh, kw]  -> (9, F, F)
    w2_taps = jnp.transpose(w2, (2, 3, 0, 1)).reshape(9, F, F)

    # shortcut AvgPool2d(1,2): every-other pixel, zero-padded to all F channels
    d = jnp.transpose(x[:, :, ::2, ::2], (1, 0, 2, 3)).reshape(Cin, M)
    d_pad = jnp.pad(d, ((0, F - Cin), (0, 0)))                   # (F, M)

    # per-tap zero-padding masks for conv2 (1 where the 3x3 neighbour is in bounds)
    ii = jnp.arange(Ho)
    jj = jnp.arange(Wo)
    mask_rows = []
    for kh in range(3):
        vi = ((ii + kh - 1) >= 0) & ((ii + kh - 1) < Ho)
        for kw in range(3):
            vj = ((jj + kw - 1) >= 0) & ((jj + kw - 1) < Wo)
            m2 = (vi[:, None] & vj[None, :]).astype(jnp.float32)   # (Ho, Wo)
            mask_rows.append(jnp.tile(m2.reshape(-1), N))          # (M,)
    masks = jnp.stack(mask_rows, axis=0)                           # (9, M)

    # static lane-rotation amounts for the 9 conv2 taps:
    # col_t[m] = h1[m + s], s = (kh-1)*Wo + (kw-1); jnp.roll convention -> shift = -s
    shifts = tuple(int((roll_sign * ((kh - 1) * Wo + (kw - 1))) % M)
                   for kh in range(3) for kw in range(3))

    kernel = functools.partial(_resblock_kernel, shifts)
    vmem = pl.BlockSpec(memory_space=pltpu.MemorySpace.VMEM)
    out_fm = pl.pallas_call(
        kernel,
        out_shape=jax.ShapeDtypeStruct((F, M), jnp.float32),
        in_specs=[vmem] * 9,
        out_specs=vmem,
        compiler_params=pltpu.CompilerParams(vmem_limit_bytes=32 * 1024 * 1024),
    )(p1.astype(jnp.bfloat16), d_pad, masks.astype(jnp.bfloat16),
      w1f.astype(jnp.bfloat16), w2_taps.astype(jnp.bfloat16),
      g1.reshape(F, 1).astype(jnp.float32), b1.reshape(F, 1).astype(jnp.float32),
      g2.reshape(F, 1).astype(jnp.float32), b2.reshape(F, 1).astype(jnp.float32))

    # (F, N*Ho*Wo) -> NCHW
    return jnp.transpose(out_fm.reshape(F, N, Ho, Wo), (1, 0, 2, 3))


def resblock_reference(x, params):
    """Pure-JAX f32 reference of the PyTorch ResBlock forward (training-mode BN)."""
    w1, w2, g1, b1, g2, b2 = params
    dn = ("NCHW", "OIHW", "NCHW")

    def bn(h, g, b):
        mean = jnp.mean(h, axis=(0, 2, 3), keepdims=True)
        var = jnp.mean((h - mean) ** 2, axis=(0, 2, 3), keepdims=True)
        return ((h - mean) * jax.lax.rsqrt(var + EPS) * g.reshape(1, -1, 1, 1)
                + b.reshape(1, -1, 1, 1))

    h = jax.lax.conv_general_dilated(x, w1, (2, 2), ((1, 1), (1, 1)),
                                     dimension_numbers=dn,
                                     precision=jax.lax.Precision.HIGHEST)
    h = _celu(bn(h, g1, b1))
    h = jax.lax.conv_general_dilated(h, w2, (1, 1), ((1, 1), (1, 1)),
                                     dimension_numbers=dn,
                                     precision=jax.lax.Precision.HIGHEST)
    h = bn(h, g2, b2)
    d = x[:, :, ::2, ::2]
    h = h + jnp.concatenate([d, jnp.zeros_like(d)], axis=1)
    return _celu(h)


def init_params(key, filt, use_subsample=True):
    """Parameters in PyTorch layout: conv weights OIHW, BN gamma/beta per channel."""
    cin = filt // 2 if use_subsample else filt
    k1, k2 = jax.random.split(key)

    def kaiming_uniform(k, cout, cin_):
        fan_in = cin_ * 3 * 3
        bound = jnp.sqrt(6.0 / fan_in)            # torch kaiming_uniform_, gain=sqrt(2)
        return jax.random.uniform(k, (cout, cin_, 3, 3), jnp.float32,
                                  minval=-bound, maxval=bound)

    w1 = kaiming_uniform(k1, filt, cin)
    w2 = kaiming_uniform(k2, filt, filt)
    g1 = jnp.ones((filt,), jnp.float32)
    b1 = jnp.zeros((filt,), jnp.float32)
    g2 = jnp.ones((filt,), jnp.float32)
    b2 = jnp.zeros((filt,), jnp.float32)
    return (w1, w2, g1, b1, g2, b2)


if __name__ == "__main__":
    key = jax.random.PRNGKey(0)
    kx, kp = jax.random.split(key)

    FILT = 4                                  # ResBlock(filter=4) -> conv1 in-channels = 2
    N, H, W = 2, 16, 16
    x = jax.random.normal(kx, (N, FILT // 2, H, W), jnp.float32)       # NCHW input

    params = init_params(kp, FILT, use_subsample=True)

    y = jax.block_until_ready(resblock_forward(x, params))
    assert y.shape == (N, FILT, H // 2, W // 2), y.shape
    assert bool(jnp.all(jnp.isfinite(y)))

    # Cross-check against the pure-JAX f32 reference (bf16 matmul operands in the
    # kernel -> loose tolerance).
    y_ref = resblock_reference(x, params)
    err = float(jnp.max(jnp.abs(y - y_ref)))
    if err >= 1e-1:
        # Defensive one-time retry: some Mosaic releases used the opposite rotate
        # direction for pltpu.roll; flip the static shift sign and re-check.
        y = jax.block_until_ready(resblock_forward(x, params, roll_sign=1))
        err = float(jnp.max(jnp.abs(y - y_ref)))
    assert err < 1e-1, f"max abs error vs reference: {err}"

    print("KERNEL_OK")
</pallas_src>

<mosaic_0001>
module attributes {stable_mosaic.version = 11 : i64} {
  func.func @_resblock_kernel(%arg0: memref<24x128xbf16, #tpu.memory_space<vmem>>, %arg1: memref<4x128xf32, #tpu.memory_space<vmem>>, %arg2: memref<9x128xbf16, #tpu.memory_space<vmem>>, %arg3: memref<4x24xbf16, #tpu.memory_space<vmem>>, %arg4: memref<9x4x4xbf16, #tpu.memory_space<vmem>>, %arg5: memref<4x1xf32, #tpu.memory_space<vmem>>, %arg6: memref<4x1xf32, #tpu.memory_space<vmem>>, %arg7: memref<4x1xf32, #tpu.memory_space<vmem>>, %arg8: memref<4x1xf32, #tpu.memory_space<vmem>>, %arg9: memref<4x128xf32, #tpu.memory_space<vmem>>) attributes {dimension_semantics = [], scalar_prefetch = 0 : i64, scratch_operands = 0 : i64, tpu.core_type = #tpu.core_type<tc>} {
    %c0 = arith.constant 0 : index
    %c0_0 = arith.constant 0 : index
    %0 = vector.load %arg3[%c0, %c0_0] : memref<4x24xbf16, #tpu.memory_space<vmem>>, vector<4x24xbf16>
    %c0_1 = arith.constant 0 : index
    %c0_2 = arith.constant 0 : index
    %1 = vector.load %arg0[%c0_1, %c0_2] : memref<24x128xbf16, #tpu.memory_space<vmem>>, vector<24x128xbf16>
    %cst = arith.constant dense<0.000000e+00> : vector<4x128xf32>
    %2 = tpu.matmul %0, %1, %cst {dimension_numbers = #tpu.dot_dimension_numbers<[1], [0], [0], [1], [0, 0, 1, 1], [], []>} : vector<4x24xbf16>, vector<24x128xbf16>, vector<4x128xf32> -> vector<4x128xf32>
    %c0_3 = arith.constant 0 : index
    %c0_4 = arith.constant 0 : index
    %3 = vector.load %arg5[%c0_3, %c0_4] : memref<4x1xf32, #tpu.memory_space<vmem>>, vector<4x1xf32>
    %c0_5 = arith.constant 0 : index
    %c0_6 = arith.constant 0 : index
    %4 = vector.load %arg6[%c0_5, %c0_6] : memref<4x1xf32, #tpu.memory_space<vmem>>, vector<4x1xf32>
    %cst_7 = arith.constant dense<0.000000e+00> : vector<4xf32>
    %5 = vector.multi_reduction <add>, %2, %cst_7 [1] : vector<4x128xf32> to vector<4xf32>
    %6 = vector.shape_cast %5 : vector<4xf32> to vector<4x1xf32>
    %7 = arith.mulf %2, %2 : vector<4x128xf32>
    %cst_8 = arith.constant dense<0.000000e+00> : vector<4xf32>
    %8 = vector.multi_reduction <add>, %7, %cst_8 [1] : vector<4x128xf32> to vector<4xf32>
    %9 = vector.shape_cast %8 : vector<4xf32> to vector<4x1xf32>
    %cst_9 = arith.constant 7.812500e-03 : f32
    %10 = vector.broadcast %cst_9 : f32 to vector<4x1xf32>
    %11 = arith.mulf %6, %10 : vector<4x1xf32>
    %cst_10 = arith.constant 7.812500e-03 : f32
    %12 = vector.broadcast %cst_10 : f32 to vector<4x1xf32>
    %13 = arith.mulf %9, %12 : vector<4x1xf32>
    %14 = arith.mulf %11, %11 : vector<4x1xf32>
    %15 = arith.subf %13, %14 : vector<4x1xf32>
    %cst_11 = arith.constant 0.000000e+00 : f32
    %16 = vector.broadcast %cst_11 : f32 to vector<4x1xf32>
    %17 = arith.maximumf %15, %16 : vector<4x1xf32>
    %18 = vector.broadcast %11 : vector<4x1xf32> to vector<4x128xf32>
    %19 = arith.subf %2, %18 : vector<4x128xf32>
    %cst_12 = arith.constant 9.99999974E-6 : f32
    %20 = vector.broadcast %cst_12 : f32 to vector<4x1xf32>
    %21 = arith.addf %17, %20 : vector<4x1xf32>
    %22 = math.rsqrt %21 : vector<4x1xf32>
    %23 = arith.mulf %22, %3 : vector<4x1xf32>
    %24 = vector.broadcast %23 : vector<4x1xf32> to vector<4x128xf32>
    %25 = arith.mulf %19, %24 : vector<4x128xf32>
    %26 = vector.broadcast %4 : vector<4x1xf32> to vector<4x128xf32>
    %27 = arith.addf %25, %26 : vector<4x128xf32>
    %cst_13 = arith.constant 0.000000e+00 : f32
    %28 = vector.broadcast %cst_13 : f32 to vector<4x128xf32>
    %29 = arith.cmpf ogt, %27, %28 : vector<4x128xf32>
    %cst_14 = arith.constant 0.000000e+00 : f32
    %30 = vector.broadcast %cst_14 : f32 to vector<4x128xf32>
    %31 = arith.minimumf %27, %30 : vector<4x128xf32>
    %32 = math.exp %31 : vector<4x128xf32>
    %cst_15 = arith.constant 1.000000e+00 : f32
    %33 = vector.broadcast %cst_15 : f32 to vector<4x128xf32>
    %34 = arith.subf %32, %33 : vector<4x128xf32>
    %35 = arith.select %29, %27, %34 : vector<4x128xi1>, vector<4x128xf32>
    %c0_16 = arith.constant 0 : index
    %c0_17 = arith.constant 0 : index
    %36 = vector.load %arg2[%c0_16, %c0_17] : memref<9x128xbf16, #tpu.memory_space<vmem>>, vector<9x128xbf16>
    %37 = arith.extf %36 : vector<9x128xbf16> to vector<9x128xf32>
    %cst_18 = arith.constant 0.000000e+00 : f32
    %38 = vector.broadcast %cst_18 : f32 to vector<4x128xf32>
    %c9_i32 = arith.constant 9 : i32
    %39 = tpu.dynamic_rotate %35 by %c9_i32 dim 1 : vector<4x128xf32>, i32 -> vector<4x128xf32>
    %40 = vector.extract_strided_slice %37 {offsets = [0, 0], sizes = [1, 128], strides = [1, 1]} : vector<9x128xf32> to vector<1x128xf32>
    %41 = vector.broadcast %40 : vector<1x128xf32> to vector<4x128xf32>
    %42 = arith.mulf %39, %41 : vector<4x128xf32>
    %43 = arith.truncf %42 : vector<4x128xf32> to vector<4x128xbf16>
    %c0_19 = arith.constant 0 : index
    %c0_20 = arith.constant 0 : index
    %c0_21 = arith.constant 0 : index
    %44 = vector.load %arg4[%c0_19, %c0_20, %c0_21] : memref<9x4x4xbf16, #tpu.memory_space<vmem>>, vector<1x4x4xbf16>
    %45 = vector.shape_cast %44 : vector<1x4x4xbf16> to vector<4x4xbf16>
    %cst_22 = arith.constant dense<0.000000e+00> : vector<4x128xf32>
    %46 = tpu.matmul %45, %43, %cst_22 {dimension_numbers = #tpu.dot_dimension_numbers<[1], [0], [0], [1], [0, 0, 1, 1], [], []>} : vector<4x4xbf16>, vector<4x128xbf16>, vector<4x128xf32> -> vector<4x128xf32>
    %47 = arith.addf %38, %46 : vector<4x128xf32>
    %c8_i32 = arith.constant 8 : i32
    %48 = tpu.dynamic_rotate %35 by %c8_i32 dim 1 : vector<4x128xf32>, i32 -> vector<4x128xf32>
    %49 = vector.extract_strided_slice %37 {offsets = [1, 0], sizes = [1, 128], strides = [1, 1]} : vector<9x128xf32> to vector<1x128xf32>
    %50 = vector.broadcast %49 : vector<1x128xf32> to vector<4x128xf32>
    %51 = arith.mulf %48, %50 : vector<4x128xf32>
    %52 = arith.truncf %51 : vector<4x128xf32> to vector<4x128xbf16>
    %c1 = arith.constant 1 : index
    %c0_23 = arith.constant 0 : index
    %c0_24 = arith.constant 0 : index
    %53 = vector.load %arg4[%c1, %c0_23, %c0_24] : memref<9x4x4xbf16, #tpu.memory_space<vmem>>, vector<1x4x4xbf16>
    %54 = vector.shape_cast %53 : vector<1x4x4xbf16> to vector<4x4xbf16>
    %cst_25 = arith.constant dense<0.000000e+00> : vector<4x128xf32>
    %55 = tpu.matmul %54, %52, %cst_25 {dimension_numbers = #tpu.dot_dimension_numbers<[1], [0], [0], [1], [0, 0, 1, 1], [], []>} : vector<4x4xbf16>, vector<4x128xbf16>, vector<4x128xf32> -> vector<4x128xf32>
    %56 = arith.addf %47, %55 : vector<4x128xf32>
    %c7_i32 = arith.constant 7 : i32
    %57 = tpu.dynamic_rotate %35 by %c7_i32 dim 1 : vector<4x128xf32>, i32 -> vector<4x128xf32>
    %58 = vector.extract_strided_slice %37 {offsets = [2, 0], sizes = [1, 128], strides = [1, 1]} : vector<9x128xf32> to vector<1x128xf32>
    %59 = vector.broadcast %58 : vector<1x128xf32> to vector<4x128xf32>
    %60 = arith.mulf %57, %59 : vector<4x128xf32>
    %61 = arith.truncf %60 : vector<4x128xf32> to vector<4x128xbf16>
    %c2 = arith.constant 2 : index
    %c0_26 = arith.constant 0 : index
    %c0_27 = arith.constant 0 : index
    %62 = vector.load %arg4[%c2, %c0_26, %c0_27] : memref<9x4x4xbf16, #tpu.memory_space<vmem>>, vector<1x4x4xbf16>
    %63 = vector.shape_cast %62 : vector<1x4x4xbf16> to vector<4x4xbf16>
    %cst_28 = arith.constant dense<0.000000e+00> : vector<4x128xf32>
    %64 = tpu.matmul %63, %61, %cst_28 {dimension_numbers = #tpu.dot_dimension_numbers<[1], [0], [0], [1], [0, 0, 1, 1], [], []>} : vector<4x4xbf16>, vector<4x128xbf16>, vector<4x128xf32> -> vector<4x128xf32>
    %65 = arith.addf %56, %64 : vector<4x128xf32>
    %c1_i32 = arith.constant 1 : i32
    %66 = tpu.dynamic_rotate %35 by %c1_i32 dim 1 : vector<4x128xf32>, i32 -> vector<4x128xf32>
    %67 = vector.extract_strided_slice %37 {offsets = [3, 0], sizes = [1, 128], strides = [1, 1]} : vector<9x128xf32> to vector<1x128xf32>
    %68 = vector.broadcast %67 : vector<1x128xf32> to vector<4x128xf32>
    %69 = arith.mulf %66, %68 : vector<4x128xf32>
    %70 = arith.truncf %69 : vector<4x128xf32> to vector<4x128xbf16>
    %c3 = arith.constant 3 : index
    %c0_29 = arith.constant 0 : index
    %c0_30 = arith.constant 0 : index
    %71 = vector.load %arg4[%c3, %c0_29, %c0_30] : memref<9x4x4xbf16, #tpu.memory_space<vmem>>, vector<1x4x4xbf16>
    %72 = vector.shape_cast %71 : vector<1x4x4xbf16> to vector<4x4xbf16>
    %cst_31 = arith.constant dense<0.000000e+00> : vector<4x128xf32>
    %73 = tpu.matmul %72, %70, %cst_31 {dimension_numbers = #tpu.dot_dimension_numbers<[1], [0], [0], [1], [0, 0, 1, 1], [], []>} : vector<4x4xbf16>, vector<4x128xbf16>, vector<4x128xf32> -> vector<4x128xf32>
    %74 = arith.addf %65, %73 : vector<4x128xf32>
    %75 = vector.extract_strided_slice %37 {offsets = [4, 0], sizes = [1, 128], strides = [1, 1]} : vector<9x128xf32> to vector<1x128xf32>
    %76 = vector.broadcast %75 : vector<1x128xf32> to vector<4x128xf32>
    %77 = arith.mulf %35, %76 : vector<4x128xf32>
    %78 = arith.truncf %77 : vector<4x128xf32> to vector<4x128xbf16>
    %c4 = arith.constant 4 : index
    %c0_32 = arith.constant 0 : index
    %c0_33 = arith.constant 0 : index
    %79 = vector.load %arg4[%c4, %c0_32, %c0_33] : memref<9x4x4xbf16, #tpu.memory_space<vmem>>, vector<1x4x4xbf16>
    %80 = vector.shape_cast %79 : vector<1x4x4xbf16> to vector<4x4xbf16>
    %cst_34 = arith.constant dense<0.000000e+00> : vector<4x128xf32>
    %81 = tpu.matmul %80, %78, %cst_34 {dimension_numbers = #tpu.dot_dimension_numbers<[1], [0], [0], [1], [0, 0, 1, 1], [], []>} : vector<4x4xbf16>, vector<4x128xbf16>, vector<4x128xf32> -> vector<4x128xf32>
    %82 = arith.addf %74, %81 : vector<4x128xf32>
    %c127_i32 = arith.constant 127 : i32
    %83 = tpu.dynamic_rotate %35 by %c127_i32 dim 1 : vector<4x128xf32>, i32 -> vector<4x128xf32>
    %84 = vector.extract_strided_slice %37 {offsets = [5, 0], sizes = [1, 128], strides = [1, 1]} : vector<9x128xf32> to vector<1x128xf32>
    %85 = vector.broadcast %84 : vector<1x128xf32> to vector<4x128xf32>
    %86 = arith.mulf %83, %85 : vector<4x128xf32>
    %87 = arith.truncf %86 : vector<4x128xf32> to vector<4x128xbf16>
    %c5 = arith.constant 5 : index
    %c0_35 = arith.constant 0 : index
    %c0_36 = arith.constant 0 : index
    %88 = vector.load %arg4[%c5, %c0_35, %c0_36] : memref<9x4x4xbf16, #tpu.memory_space<vmem>>, vector<1x4x4xbf16>
    %89 = vector.shape_cast %88 : vector<1x4x4xbf16> to vector<4x4xbf16>
    %cst_37 = arith.constant dense<0.000000e+00> : vector<4x128xf32>
    %90 = tpu.matmul %89, %87, %cst_37 {dimension_numbers = #tpu.dot_dimension_numbers<[1], [0], [0], [1], [0, 0, 1, 1], [], []>} : vector<4x4xbf16>, vector<4x128xbf16>, vector<4x128xf32> -> vector<4x128xf32>
    %91 = arith.addf %82, %90 : vector<4x128xf32>
    %c121_i32 = arith.constant 121 : i32
    %92 = tpu.dynamic_rotate %35 by %c121_i32 dim 1 : vector<4x128xf32>, i32 -> vector<4x128xf32>
    %93 = vector.extract_strided_slice %37 {offsets = [6, 0], sizes = [1, 128], strides = [1, 1]} : vector<9x128xf32> to vector<1x128xf32>
    %94 = vector.broadcast %93 : vector<1x128xf32> to vector<4x128xf32>
    %95 = arith.mulf %92, %94 : vector<4x128xf32>
    %96 = arith.truncf %95 : vector<4x128xf32> to vector<4x128xbf16>
    %c6 = arith.constant 6 : index
    %c0_38 = arith.constant 0 : index
    %c0_39 = arith.constant 0 : index
    %97 = vector.load %arg4[%c6, %c0_38, %c0_39] : memref<9x4x4xbf16, #tpu.memory_space<vmem>>, vector<1x4x4xbf16>
    %98 = vector.shape_cast %97 : vector<1x4x4xbf16> to vector<4x4xbf16>
    %cst_40 = arith.constant dense<0.000000e+00> : vector<4x128xf32>
    %99 = tpu.matmul %98, %96, %cst_40 {dimension_numbers = #tpu.dot_dimension_numbers<[1], [0], [0], [1], [0, 0, 1, 1], [], []>} : vector<4x4xbf16>, vector<4x128xbf16>, vector<4x128xf32> -> vector<4x128xf32>
    %100 = arith.addf %91, %99 : vector<4x128xf32>
    %c120_i32 = arith.constant 120 : i32
    %101 = tpu.dynamic_rotate %35 by %c120_i32 dim 1 : vector<4x128xf32>, i32 -> vector<4x128xf32>
    %102 = vector.extract_strided_slice %37 {offsets = [7, 0], sizes = [1, 128], strides = [1, 1]} : vector<9x128xf32> to vector<1x128xf32>
    %103 = vector.broadcast %102 : vector<1x128xf32> to vector<4x128xf32>
    %104 = arith.mulf %101, %103 : vector<4x128xf32>
    %105 = arith.truncf %104 : vector<4x128xf32> to vector<4x128xbf16>
    %c7 = arith.constant 7 : index
    %c0_41 = arith.constant 0 : index
    %c0_42 = arith.constant 0 : index
    %106 = vector.load %arg4[%c7, %c0_41, %c0_42] : memref<9x4x4xbf16, #tpu.memory_space<vmem>>, vector<1x4x4xbf16>
    %107 = vector.shape_cast %106 : vector<1x4x4xbf16> to vector<4x4xbf16>
    %cst_43 = arith.constant dense<0.000000e+00> : vector<4x128xf32>
    %108 = tpu.matmul %107, %105, %cst_43 {dimension_numbers = #tpu.dot_dimension_numbers<[1], [0], [0], [1], [0, 0, 1, 1], [], []>} : vector<4x4xbf16>, vector<4x128xbf16>, vector<4x128xf32> -> vector<4x128xf32>
    %109 = arith.addf %100, %108 : vector<4x128xf32>
    %c119_i32 = arith.constant 119 : i32
    %110 = tpu.dynamic_rotate %35 by %c119_i32 dim 1 : vector<4x128xf32>, i32 -> vector<4x128xf32>
    %111 = vector.extract_strided_slice %37 {offsets = [8, 0], sizes = [1, 128], strides = [1, 1]} : vector<9x128xf32> to vector<1x128xf32>
    %112 = vector.broadcast %111 : vector<1x128xf32> to vector<4x128xf32>
    %113 = arith.mulf %110, %112 : vector<4x128xf32>
    %114 = arith.truncf %113 : vector<4x128xf32> to vector<4x128xbf16>
    %c8 = arith.constant 8 : index
    %c0_44 = arith.constant 0 : index
    %c0_45 = arith.constant 0 : index
    %115 = vector.load %arg4[%c8, %c0_44, %c0_45] : memref<9x4x4xbf16, #tpu.memory_space<vmem>>, vector<1x4x4xbf16>
    %116 = vector.shape_cast %115 : vector<1x4x4xbf16> to vector<4x4xbf16>
    %cst_46 = arith.constant dense<0.000000e+00> : vector<4x128xf32>
    %117 = tpu.matmul %116, %114, %cst_46 {dimension_numbers = #tpu.dot_dimension_numbers<[1], [0], [0], [1], [0, 0, 1, 1], [], []>} : vector<4x4xbf16>, vector<4x128xbf16>, vector<4x128xf32> -> vector<4x128xf32>
    %118 = arith.addf %109, %117 : vector<4x128xf32>
    %c0_47 = arith.constant 0 : index
    %c0_48 = arith.constant 0 : index
    %119 = vector.load %arg7[%c0_47, %c0_48] : memref<4x1xf32, #tpu.memory_space<vmem>>, vector<4x1xf32>
    %c0_49 = arith.constant 0 : index
    %c0_50 = arith.constant 0 : index
    %120 = vector.load %arg8[%c0_49, %c0_50] : memref<4x1xf32, #tpu.memory_space<vmem>>, vector<4x1xf32>
    %cst_51 = arith.constant dense<0.000000e+00> : vector<4xf32>
    %121 = vector.multi_reduction <add>, %118, %cst_51 [1] : vector<4x128xf32> to vector<4xf32>
    %122 = vector.shape_cast %121 : vector<4xf32> to vector<4x1xf32>
    %123 = arith.mulf %118, %118 : vector<4x128xf32>
    %cst_52 = arith.constant dense<0.000000e+00> : vector<4xf32>
    %124 = vector.multi_reduction <add>, %123, %cst_52 [1] : vector<4x128xf32> to vector<4xf32>
    %125 = vector.shape_cast %124 : vector<4xf32> to vector<4x1xf32>
    %cst_53 = arith.constant 7.812500e-03 : f32
    %126 = vector.broadcast %cst_53 : f32 to vector<4x1xf32>
    %127 = arith.mulf %122, %126 : vector<4x1xf32>
    %cst_54 = arith.constant 7.812500e-03 : f32
    %128 = vector.broadcast %cst_54 : f32 to vector<4x1xf32>
    %129 = arith.mulf %125, %128 : vector<4x1xf32>
    %130 = arith.mulf %127, %127 : vector<4x1xf32>
    %131 = arith.subf %129, %130 : vector<4x1xf32>
    %cst_55 = arith.constant 0.000000e+00 : f32
    %132 = vector.broadcast %cst_55 : f32 to vector<4x1xf32>
    %133 = arith.maximumf %131, %132 : vector<4x1xf32>
    %134 = vector.broadcast %127 : vector<4x1xf32> to vector<4x128xf32>
    %135 = arith.subf %118, %134 : vector<4x128xf32>
    %cst_56 = arith.constant 9.99999974E-6 : f32
    %136 = vector.broadcast %cst_56 : f32 to vector<4x1xf32>
    %137 = arith.addf %133, %136 : vector<4x1xf32>
    %138 = math.rsqrt %137 : vector<4x1xf32>
    %139 = arith.mulf %138, %119 : vector<4x1xf32>
    %140 = vector.broadcast %139 : vector<4x1xf32> to vector<4x128xf32>
    %141 = arith.mulf %135, %140 : vector<4x128xf32>
    %142 = vector.broadcast %120 : vector<4x1xf32> to vector<4x128xf32>
    %143 = arith.addf %141, %142 : vector<4x128xf32>
    %c0_57 = arith.constant 0 : index
    %c0_58 = arith.constant 0 : index
    %144 = vector.load %arg1[%c0_57, %c0_58] : memref<4x128xf32, #tpu.memory_space<vmem>>, vector<4x128xf32>
    %145 = arith.addf %143, %144 : vector<4x128xf32>
    %cst_59 = arith.constant 0.000000e+00 : f32
    %146 = vector.broadcast %cst_59 : f32 to vector<4x128xf32>
    %147 = arith.cmpf ogt, %145, %146 : vector<4x128xf32>
    %cst_60 = arith.constant 0.000000e+00 : f32
    %148 = vector.broadcast %cst_60 : f32 to vector<4x128xf32>
    %149 = arith.minimumf %145, %148 : vector<4x128xf32>
    %150 = math.exp %149 : vector<4x128xf32>
    %cst_61 = arith.constant 1.000000e+00 : f32
    %151 = vector.broadcast %cst_61 : f32 to vector<4x128xf32>
    %152 = arith.subf %150, %151 : vector<4x128xf32>
    %153 = arith.select %147, %145, %152 : vector<4x128xi1>, vector<4x128xf32>
    %c0_62 = arith.constant 0 : index
    %c0_63 = arith.constant 0 : index
    %154 = vector.load %arg9[%c0_62, %c0_63] : memref<4x128xf32, #tpu.memory_space<vmem>>, vector<4x128xf32>
    tpu.vector_store %arg9[%c0_62, %c0_63], %153 {strides = array<i32>} : memref<4x128xf32, #tpu.memory_space<vmem>>, vector<4x128xf32>,
    return
  }
}

</mosaic_0001>

<bundles_post_ra>
// kernel: tpu_custom_call.1
= control target key start
LH: loop header
LB: loop body
LE: loop exit
PB: predicated region body
PF: predicated region fallthrough
CT: control target
= control target key end

     0   :  { %s645_s0 = inlined_call_operand.vmem [shape: bf16[24,128], index: 0, kind: input, shape index: {}]   ;;  %s646_s1 = inlined_call_operand.vmem [shape: f32[4,128], index: 1, kind: input, shape index: {}]   ;;  %s647_s2 = inlined_call_operand.vmem [shape: bf16[9,128], index: 2, kind: input, shape index: {}]   ;;  %s648_s3 = inlined_call_operand.vmem [shape: bf16[4,24], index: 3, kind: input, shape index: {}]   ;;  %s649_s4 = inlined_call_operand.vmem [shape: bf16[9,4,4], index: 4, kind: input, shape index: {}]   ;;  %s650_s5 = inlined_call_operand.vmem [shape: f32[4,1], index: 5, kind: input, shape index: {}]   ;;  %s651_s6 = inlined_call_operand.vmem [shape: f32[4,1], index: 6, kind: input, shape index: {}]   ;;  %s652_s7 = inlined_call_operand.vmem [shape: f32[4,1], index: 7, kind: input, shape index: {}]   ;;  %s653_s8 = inlined_call_operand.vmem [shape: f32[4,1], index: 8, kind: input, shape index: {}]   ;;  %s654_s9 = inlined_call_operand.hbm [shape: f32[4,128], index: 9, kind: output, shape index: {}]  }
   0x1   :  { %v37_v0 = vld [vmem:[%s645_s0 + $0x8] sm:$0xf] }
   0x2   :  { %v43_v1 = vunpack.c.l.b16 %v37_v0 }
   0x3   :  { %14 = vsyncpa [#allocation3], 0  ;;  %vm51_vm0 = vcmask 1043456   ;;  %v445_v4 = vld [vmem:[%s645_s0] sm:$0xff]  ;;  %vm47_vm1 = vcmask 195584   ;;  %v492_v11 = vmov 0  }
   0x4   :  { %v45_v2 = vpack.c.b16 %v43_v1, %v43_v1  ;;  %v34_v5 = vld [vmem:[%s648_s3] sm:$0x3]  ;;  %456 = vset.pattern.permute.xlu1 %v492_v11  ;;  %457 = vset.pattern.permute.xlu0 %v492_v11  ;;  %s494_s17 = smov 7   ;;  %s495_s18 = smov 9   ;;  %vm134_vm6 = vcmask 1041408   ;;  %vm130_vm7 = vcmask 31744  }
   0x5   :  { %v68_v25 = vld [vmem:[%s650_s5] sm:$0xf]  ;;  %s493_s5 = smov 1   ;;  %s497_s19 = smov 8   ;;  %v114_v0 = vld [vmem:[%s647_s2 + $0x4] sm:$0x1] }
   0x6   :  { %v53_v3 = vsel %vm51_vm0, %v45_v2, 0  ;;  %v69_v29 = vld [vmem:[%s651_s6] sm:$0xf]  ;;  %s496_s6 = smov 119   ;;  %s498_s20 = smov 120  }
   0x7   :  { %61 = vmatpush.bf16.msra.mxu0 %v53_v3  ;;  %s499_s21 = smov 127   ;;  %s500_s22 = smov 121   ;;  %v113_v40 = vld [vmem:[%s647_s2] sm:$0xf]  ;;  %v434_v1 = vld [vmem:[%s649_s4 + $0x8] sm:$0x3] }
   0x8   :  { %v573_v41 = vunpack.c.l.bf16 %v113_v40  ;;  %v122_v52 = vld [vmem:[%s649_s4] sm:$0x3]  ;;  %v427_v57 = vld [vmem:[%s649_s4 + $0x2] sm:$0x3] }
   0xa   :  { %v224_v42 = vperm.slane %v573_v41, 4  ;;  %v119_v43 = vperm.slane %v573_v41, 0  ;;  %v125_v50 = vperm.slane %v573_v41, 1  ;;  %v251_v59 = vperm.slane %v573_v41, 5 }
   0xb   :  { %62 = vmatpush.bf16.msra.mxu0 %v445_v4  ;;  %v199_v60 = vperm.slane %v573_v41, 3  ;;  %v172_v61 = vperm.slane %v573_v41, 2  ;;  %v278_v63 = vperm.slane %v573_v41, 6 }
   0xe   :  { %425 = vmatmul.msk.bf16.vlgmr.msra.gmra.mxu0 %vm47_vm1, %v34_v5 }
  0x8b   :  { %v64_v6 = vpop.f32.mrf.mxu0 }
  0x8c   :  { %v70_v7 = vsel %vm51_vm0, %v64_v6, 0.0  ;;  %v73_v8 = vmul.f32 %v64_v6, %v64_v6 }
  0x8d   :  { %71 = vadd.xlane.f32.xlu0 %v70_v7  ;;  %v116_v7 = vunpack.c.l.bf16 %v114_v0 }
  0x8e   :  { %v74_v10 = vsel %vm51_vm0, %v73_v8, 0.0 }
  0x93   :  { %v66_v9 = vpop.f32.mrf.mxu0 }
  0x95   :  { %75 = vadd.xlane.f32.xlu0 %v74_v10 }
 0x100   :  { %v72_v12 = vpop.xlane.xlu0 %71 }
 0x101   :  { %v77_v13 = vmul.f32 0.0078125, %v72_v12 }
 0x103   :  { %v79_v15 = vmul.f32 %v77_v13, %v77_v13  ;;  %v82_v31 = vsub.f32 %v64_v6, %v77_v13 }
 0x108   :  { %v76_v14 = vpop.xlane.xlu0 %75 }
 0x109   :  { %v78_v16 = vmul.f32 0.0078125, %v76_v14 }
 0x10b   :  { %v80_v17 = vsub.f32 %v78_v16, %v79_v15  ;;  %v332_v15 = vperm.slane %v116_v7, 0 }
 0x10d   :  { %v81_v18 = vmax.f32 %v80_v17, 0.0 }
 0x10f   :  { %v83_v19 = vadd.f32 1e-05, %v81_v18  ;;  %v430_v18 = vld [vmem:[%s649_s4 + $0x4] sm:$0x3] }
 0x111   :  { %458 = vrsqrt.f32 %v83_v19  ;;  %vm90_vm3 = vweird.f32 %v83_v19 }
 0x117   :  { %v459_v20 = vpop.eup %458 }
 0x118   :  { %v85_v21 = vmul.f32 %v459_v20, %v83_v19  ;;  %vm91_vm2 = vweird.f32 %v459_v20  ;;  %v432_v19 = vld [vmem:[%s649_s4 + $0x6] sm:$0x3] }
 0x119   :  { %vm92_vm4 = vmor %vm90_vm3, %vm91_vm2 }
 0x11a   :  { %v86_v22 = vmul.f32 %v459_v20, %v85_v21 }
 0x11c   :  { %v87_v23 = vmul.f32 0.5, %v86_v22 }
 0x11e   :  { %v88_v24 = vsub.f32 1.5, %v87_v23 }
 0x120   :  { %v89_v26 = vmul.f32 %v459_v20, %v88_v24 }
 0x122   :  { %v93_v27 = vsel %vm92_vm4, %v459_v20, %v89_v26  ;;  %v438_v20 = vld [vmem:[%s649_s4 + $0xc] sm:$0x3]  ;;  %v442_v26 = vld [vmem:[%s649_s4 + $0x10] sm:$0x3] }
 0x123   :  { %v94_v28 = vmul.f32 %v93_v27, %v68_v25  ;;  %v305_v25 = vperm.slane %v573_v41, 7 }
 0x125   :  { %97 = vperm.xlu1 %456, %v94_v28  }
 0x12d   :  { %103 = vperm.xlu1 %456, %v69_v29  }
 0x197   :  { %v98_v30 = vpop.permute.xlu1 %97 }
 0x198   :  { %v100_v32 = vmul.f32 %v98_v30, %v82_v31  ;;  %v436_v31 = vld [vmem:[%s649_s4 + $0xa] sm:$0x3] }
 0x19f   :  { %v104_v33 = vpop.permute.xlu1 %103 }
 0x1a0   :  { %v106_v34 = vadd.f32 %v104_v33, %v100_v32  ;;  %v440_v32 = vld [vmem:[%s649_s4 + $0xe] sm:$0x3] }
 0x1a2   :  { %v108_v35 = vmin.f32 %v106_v34, 0.0  ;;  %vm107_vm5 = vcmp.gt.f32.partialorder %v106_v34, 0.0 }
 0x1a4   :  { %v109_v36 = vmul.f32 1.442695, %v108_v35 }
 0x1a6   :  { %460 = vpow2.f32 %v109_v36 }
 0x1ac   :  { %v461_v37 = vpop.eup %460 }
 0x1ad   :  { %v426_v38 = vadd.f32 -1.0, %v461_v37 }
 0x1af   :  { %v112_v39 = vsel %vm107_vm5, %v106_v34, %v426_v38 }
 0x1b0   :  { %197 = vrot.lane.b32.xlu1 %v112_v39, %s493_s5  ;;  %170 = vrot.lane.b32.xlu0 %v112_v39, %s494_s17  ;;  %v225_v44 = vmul.f32 %v224_v42, %v112_v39 }
 0x1b1   :  { %117 = vrot.lane.b32.xlu2 %v112_v39, %s495_s18 }
 0x1b2   :  { %v226_v47 = vpack.c.bf16 %v225_v44, %v225_v44 }
 0x1b4   :  { %v233_v51 = vsel %vm134_vm6, %v226_v47, 0 }
 0x1b8   :  { %330 = vrot.lane.b32.xlu1 %v112_v39, %s496_s6 }
 0x1b9   :  { %123 = vrot.lane.b32.xlu2 %v112_v39, %s497_s19 }
 0x1c0   :  { %303 = vrot.lane.b32.xlu1 %v112_v39, %s498_s20 }
 0x1c1   :  { %249 = vrot.lane.b32.xlu2 %v112_v39, %s499_s21 }
 0x1c9   :  { %276 = vrot.lane.b32.xlu2 %v112_v39, %s500_s22 }
 0x20b   :  { %v118_v45 = vpop.permute.xlu2 %117 }
 0x20c   :  { %v120_v46 = vmul.f32 %v119_v43, %v118_v45 }
 0x20e   :  { %v121_v48 = vpack.c.bf16 %v120_v46, %v120_v46 }
 0x210   :  { %v155_v49 = vsel %vm134_vm6, %v121_v48, 0 }
 0x211   :  { %164 = vmatpush.bf16.msra.mxu2 %v155_v49 }
 0x213   :  { %v124_v53 = vpop.permute.xlu2 %123 }
 0x214   :  { %v126_v54 = vmul.f32 %v125_v50, %v124_v53  ;;  %429 = vmatmul.msk.bf16.vlgmr.msra.gmra.mxu2 %vm130_vm7, %v122_v52 }
 0x215   :  { %242 = vmatpush.bf16.msrb.mxu2 %v233_v51 }
 0x216   :  { %v127_v55 = vpack.c.bf16 %v126_v54, %v126_v54 }
 0x218   :  { %v136_v56 = vsel %vm134_vm6, %v127_v55, 0 }
 0x219   :  { %145 = vmatpush.bf16.msra.mxu1 %v136_v56 }
 0x21b   :  { %v250_v58 = vpop.permute.xlu2 %249 }
 0x21c   :  { %428 = vmatmul.msk.bf16.vlgmr.msra.gmra.mxu1 %vm130_vm7, %v427_v57  ;;  %v252_v62 = vmul.f32 %v251_v59, %v250_v58 }
 0x21e   :  { %v253_v8 = vpack.c.bf16 %v252_v62, %v252_v62 }
 0x220   :  { %v260_v17 = vsel %vm134_vm6, %v253_v8, 0 }
 0x222   :  { %v198_v2 = vpop.permute.xlu1 %197  ;;  %v171_v3 = vpop.permute.xlu0 %170 }
 0x223   :  { %v200_v4 = vmul.f32 %v199_v60, %v198_v2  ;;  %v173_v5 = vmul.f32 %v172_v61, %v171_v3  ;;  %v277_v6 = vpop.permute.xlu2 %276 }
 0x224   :  { %v279_v9 = vmul.f32 %v278_v63, %v277_v6  ;;  %435 = vmatmul.msk.bf16.vlgmr.msrb.gmra.mxu2 %vm130_vm7, %v434_v1 }
 0x225   :  { %v201_v10 = vpack.c.bf16 %v200_v4, %v200_v4  ;;  %v174_v11 = vpack.c.bf16 %v173_v5, %v173_v5 }
 0x226   :  { %v280_v12 = vpack.c.bf16 %v279_v9, %v279_v9 }
 0x227   :  { %v181_v13 = vsel %vm134_vm6, %v174_v11, 0  ;;  %v208_v14 = vsel %vm134_vm6, %v201_v10, 0  ;;  %v357_v11 = vld [vmem:[%s652_s7] sm:$0xf]  ;;  %s501_s7 = smov [#allocation2]  }
 0x228   :  { %190 = vmatpush.bf16.msra.mxu3 %v181_v13  ;;  %217 = vmatpush.bf16.msrb.mxu1 %v208_v14  ;;  %v287_v16 = vsel %vm134_vm6, %v280_v12, 0  ;;  %s410_s24 = sshll.u32 %s501_s7, 4  ;;  %s411_s24 = int_to_ptr.vmem [resolvable:$true] %s410_s24 }
 0x229   :  { %296 = vmatpush.bf16.msrb.mxu0 %v287_v16 }
 0x22a   :  { %v331_v21 = vpop.permute.xlu1 %330 }
 0x22b   :  { %v333_v22 = vmul.f32 %v332_v15, %v331_v21  ;;  %431 = vmatmul.msk.bf16.vlgmr.msra.gmra.mxu3 %vm130_vm7, %v430_v18  ;;  %v358_v15 = vld [vmem:[%s653_s8] sm:$0xf]  ;;  %s412_s8 = sshll.u32 %s654_s9, 4  ;;  %s413_s8 = int_to_ptr.hbm [resolvable:$true] %s412_s8 }
 0x22c   :  { %269 = vmatpush.bf16.msrb.mxu3 %v260_v17  ;;  %433 = vmatmul.msk.bf16.vlgmr.msrb.gmra.mxu1 %vm130_vm7, %v432_v19  ;;  %v396_v19 = vld [vmem:[%s646_s1] sm:$0xf] }
 0x22d   :  { %439 = vmatmul.msk.bf16.vlgmr.msrb.gmra.mxu0 %vm130_vm7, %v438_v20  ;;  %v334_v23 = vpack.c.bf16 %v333_v22, %v333_v22 }
 0x22f   :  { %v341_v24 = vsel %vm134_vm6, %v334_v23, 0 }
 0x230   :  { %350 = vmatpush.bf16.msra.mxu2 %v341_v24 }
 0x232   :  { %v304_v27 = vpop.permute.xlu1 %303 }
 0x233   :  { %v306_v28 = vmul.f32 %v305_v25, %v304_v27 }
 0x234   :  { %443 = vmatmul.msk.bf16.vlgmr.msra.gmra.mxu2 %vm130_vm7, %v442_v26 }
 0x235   :  { %v307_v29 = vpack.c.bf16 %v306_v28, %v306_v28 }
 0x237   :  { %v314_v30 = vsel %vm134_vm6, %v307_v29, 0 }
 0x238   :  { %323 = vmatpush.bf16.msra.mxu1 %v314_v30 }
 0x23b   :  { %437 = vmatmul.msk.bf16.vlgmr.msrb.gmra.mxu3 %vm130_vm7, %v436_v31 }
 0x23c   :  { %441 = vmatmul.msk.bf16.vlgmr.msra.gmra.mxu1 %vm130_vm7, %v440_v32 }
 0x297   :  { %v166_v33 = vpop.f32.mrf.mxu2 }
 0x299   :  { %v147_v34 = vpop.f32.mrf.mxu1 }
 0x29a   :  { %v167_v44 = vadd.f32 %v166_v33, %v147_v34 }
 0x29f   :  { %v168_v35 = vpop.f32.mrf.mxu2 }
 0x2a1   :  { %v149_v36 = vpop.f32.mrf.mxu1 }
 0x2a7   :  { %v244_v37 = vpop.f32.mrf.mxu2 }
 0x2a9   :  { %v219_v38 = vpop.f32.mrf.mxu1 }
 0x2aa   :  { %v298_v39 = vpop.f32.mrf.mxu0 }
 0x2ae   :  { %v192_v40 = vpop.f32.mrf.mxu3 }
 0x2af   :  { %v246_v41 = vpop.f32.mrf.mxu2  ;;  %v196_v45 = vadd.f32 %v192_v40, %v167_v44 }
 0x2b1   :  { %v221_v42 = vpop.f32.mrf.mxu1  ;;  %v223_v48 = vadd.f32 %v219_v38, %v196_v45 }
 0x2b2   :  { %v300_v43 = vpop.f32.mrf.mxu0 }
 0x2b3   :  { %v248_v50 = vadd.f32 %v244_v37, %v223_v48 }
 0x2b6   :  { %v194_v46 = vpop.f32.mrf.mxu3 }
 0x2b7   :  { %v352_v47 = vpop.f32.mrf.mxu2 }
 0x2b9   :  { %v325_v49 = vpop.f32.mrf.mxu1 }
 0x2be   :  { %v271_v51 = vpop.f32.mrf.mxu3 }
 0x2bf   :  { %v275_v52 = vadd.f32 %v271_v51, %v248_v50  ;;  %v354_v53 = vpop.f32.mrf.mxu2 }
 0x2c1   :  { %v302_v54 = vadd.f32 %v298_v39, %v275_v52  ;;  %v327_v55 = vpop.f32.mrf.mxu1 }
 0x2c3   :  { %v329_v56 = vadd.f32 %v325_v49, %v302_v54 }
 0x2c5   :  { %v356_v57 = vadd.f32 %v352_v47, %v329_v56 }
 0x2c6   :  { %v273_v58 = vpop.f32.mrf.mxu3 }
 0x2c7   :  { %v359_v59 = vsel %vm51_vm0, %v356_v57, 0.0  ;;  %v362_v60 = vmul.f32 %v356_v57, %v356_v57 }
 0x2c8   :  { %360 = vadd.xlane.f32.xlu2 %v359_v59 }
 0x2c9   :  { %v363_v61 = vsel %vm51_vm0, %v362_v60, 0.0 }
 0x2ca   :  { %364 = vadd.xlane.f32.xlu0 %v363_v61 }
 0x33b   :  { %v361_v62 = vpop.xlane.xlu2 %360 }
 0x33c   :  { %v366_v63 = vmul.f32 0.0078125, %v361_v62 }
 0x33d   :  { %v365_v0 = vpop.xlane.xlu0 %364 }
 0x33e   :  { %v368_v1 = vmul.f32 %v366_v63, %v366_v63  ;;  %v367_v2 = vmul.f32 0.0078125, %v365_v0  ;;  %v371_v17 = vsub.f32 %v356_v57, %v366_v63 }
 0x340   :  { %v369_v3 = vsub.f32 %v367_v2, %v368_v1 }
 0x342   :  { %v370_v4 = vmax.f32 %v369_v3, 0.0 }
 0x344   :  { %v372_v5 = vadd.f32 1e-05, %v370_v4 }
 0x346   :  { %462 = vrsqrt.f32 %v372_v5  ;;  %vm379_vm9 = vweird.f32 %v372_v5 }
 0x34c   :  { %v463_v6 = vpop.eup %462 }
 0x34d   :  { %v374_v7 = vmul.f32 %v463_v6, %v372_v5  ;;  %vm380_vm8 = vweird.f32 %v463_v6 }
 0x34e   :  { %vm381_vm10 = vmor %vm379_vm9, %vm380_vm8 }
 0x34f   :  { %v375_v8 = vmul.f32 %v463_v6, %v374_v7 }
 0x351   :  { %v376_v9 = vmul.f32 0.5, %v375_v8 }
 0x353   :  { %v377_v10 = vsub.f32 1.5, %v376_v9 }
 0x355   :  { %v378_v12 = vmul.f32 %v463_v6, %v377_v10 }
 0x357   :  { %v382_v13 = vsel %vm381_vm10, %v463_v6, %v378_v12 }
 0x358   :  { %v383_v14 = vmul.f32 %v382_v13, %v357_v11 }
 0x35a   :  { %386 = vperm.xlu1 %456, %v383_v14  }
 0x362   :  { %392 = vperm.xlu1 %456, %v358_v15  }
 0x3cc   :  { %v387_v16 = vpop.permute.xlu1 %386 }
 0x3cd   :  { %v389_v18 = vmul.f32 %v387_v16, %v371_v17 }
 0x3d4   :  { %v393_v20 = vpop.permute.xlu1 %392 }
 0x3d5   :  { %v395_v21 = vadd.f32 %v393_v20, %v389_v18 }
 0x3d7   :  { %v397_v22 = vadd.f32 %v396_v19, %v395_v21 }
 0x3d9   :  { %v399_v23 = vmin.f32 %v397_v22, 0.0  ;;  %vm398_vm11 = vcmp.gt.f32.partialorder %v397_v22, 0.0 }
 0x3db   :  { %v400_v24 = vmul.f32 1.442695, %v399_v23 }
 0x3dd   :  { %464 = vpow2.f32 %v400_v24 }
 0x3e3   :  { %v465_v25 = vpop.eup %464 }
 0x3e4   :  { %v444_v26 = vadd.f32 -1.0, %v465_v25 }
 0x3e6   :  { %v403_v27 = vsel %vm398_vm11, %v397_v22, %v444_v26 }
 0x3e7   :  { %404 = vst [vmem:[#allocation2] sm:$0xf] %v403_v27 }
 0x3e8   :  { %415 = dma.vmem_to_hbm [thread:$0]  %s411_s24, 64, %s413_s8, [#allocation3]  }
 0x3e9   :  { %490 = dma.done.wait [#allocation3], 64  }
 0x3ea   :  { %491 = vsyncadd [#allocation3], 4294967232 }
 0x3eb   :  { %420 = vsyncpa [#allocation3], 1 }

</bundles_post_ra>
